<compile_context>
chip_gen: v7x
topology: tpu7x:2x2x1
jax: 0.10.0
libtpu: 0.0.40
codegen_flags: <defaults>
</compile_context>

<pallas_src>
import jax
import jax.numpy as jnp
from jax import lax
from jax.experimental import pallas as pl
from jax.experimental.pallas import tpu as pltpu


def qnorm_kernel(v_ref, lam_ref, out_ref):
    """One lane-block of TB batch elements.

    v_ref:   (2, N, N, TB) f32 -- [real, imag] eigenvector planes; V[b, i, k]
             lives at v_ref[plane, i, k, b] (batch on the lane axis).
    lam_ref: (N, TB)       f32 -- eigenvalues; lam[b, k] lives at lam_ref[k, b].
    out_ref: (2, N, N, TB) f32 -- [real, imag] of (V diag(lam) V^H)[b, i, j].
    """
    n = v_ref.shape[1]
    tb = v_ref.shape[3]

    def row_body(i, carry):
        # Eigenvalue-scaled row i of V:  s[k, b] = lam[k, b] * V[b, i, k]
        lam = lam_ref[...]                                  # (N_k, TB)
        sri = lam * v_ref[0, pl.ds(i, 1), :, :][0]          # (N_k, TB)
        sii = lam * v_ref[1, pl.ds(i, 1), :, :][0]          # (N_k, TB)

        def col_body(j, c):
            # Row j of V -- dynamic index on an outer dim (cheap address math).
            vrj = v_ref[0, pl.ds(j, 1), :, :][0]            # (N_k, TB)
            vij = v_ref[1, pl.ds(j, 1), :, :][0]            # (N_k, TB)
            # result[i, j, b] = sum_k lam[k, b] * V[b, i, k] * conj(V[b, j, k])
            rr = jnp.sum(sri * vrj + sii * vij, axis=0)[None, None, :]  # (1,1,TB)
            ri = jnp.sum(sii * vrj - sri * vij, axis=0)[None, None, :]  # (1,1,TB)
            # Upper-triangle element (i, j).
            out_ref[0, pl.ds(i, 1), pl.ds(j, 1), :] = rr
            out_ref[1, pl.ds(i, 1), pl.ds(j, 1), :] = ri
            # Hermitian mirror (j, i): real symmetric, imag antisymmetric.
            out_ref[0, pl.ds(j, 1), pl.ds(i, 1), :] = rr
            out_ref[1, pl.ds(j, 1), pl.ds(i, 1), :] = -ri
            return c

        lax.fori_loop(i, n, col_body, 0)
        # clear_dia: the imaginary part of the diagonal is exactly zero.
        out_ref[1, pl.ds(i, 1), pl.ds(i, 1), :] = jnp.zeros((1, 1, tb), jnp.float32)
        return carry

    lax.fori_loop(0, n, row_body, 0)


def _pick_block(bh):
    """Lane-block size TB: large multiples of 128, but keep >= 2 grid steps
    (megacore sharding on v7x) and <= 512 (per-slice vreg pressure, and the
    double-buffered blocks stay far below v5e's 16 MiB scoped-VMEM default)."""
    for tb in (512, 256, 128):
        if bh >= 2 * tb:
            return tb
    if bh >= 128:
        return 128
    return bh               # block == full dim satisfies the (8, 128) rule


@jax.jit
def qnorm_forward(x):
    """x: (B, H, N, N) complex64 Hermitian -> (B, H, N, N) complex64."""
    B, H, N, _ = x.shape
    BH = B * H

    # TODO(synk): torch.linalg.eigh (complex Hermitian eigendecomposition) has
    # no clean Pallas equivalent; it is computed with XLA's eigh here.
    v1, v2 = jnp.linalg.eigh(x)          # v1: (B,H,N) f32, v2: (B,H,N,N) c64

    # Lane-dense layout plumbing, merged into a single stacked transpose:
    # (2, BH, N, N) -> (2, N, N, BH) with batch on the lane axis.
    planes = jnp.stack([jnp.real(v2), jnp.imag(v2)], axis=0).astype(jnp.float32)
    planes = planes.reshape(2, BH, N, N)
    v_planes = jnp.transpose(planes, (0, 2, 3, 1))                 # (2, N, N, BH)
    lam = jnp.transpose(v1.astype(jnp.float32).reshape(BH, N))     # (N, BH)

    tb = _pick_block(BH)
    bh_pad = ((BH + tb - 1) // tb) * tb
    if bh_pad != BH:
        v_planes = jnp.pad(v_planes, ((0, 0), (0, 0), (0, 0), (0, bh_pad - BH)))
        lam = jnp.pad(lam, ((0, 0), (0, bh_pad - BH)))

    cost = pl.CostEstimate(
        flops=8 * N * N * N * BH,
        transcendentals=0,
        bytes_accessed=4 * BH * (4 * N * N + N),
    )

    out = pl.pallas_call(
        qnorm_kernel,
        out_shape=jax.ShapeDtypeStruct((2, N, N, bh_pad), jnp.float32),
        grid_spec=pltpu.PrefetchScalarGridSpec(
            num_scalar_prefetch=0,
            grid=(bh_pad // tb,),
            in_specs=[
                pl.BlockSpec((2, N, N, tb), lambda b: (0, 0, 0, b)),
                pl.BlockSpec((N, tb), lambda b: (0, b)),
            ],
            out_specs=pl.BlockSpec((2, N, N, tb), lambda b: (0, 0, 0, b)),
        ),
        # Batch axis is embarrassingly parallel; shards the grid across both
        # TensorCores on v7x (no-op on single-TC v5e/v6e).
        compiler_params=pltpu.CompilerParams(dimension_semantics=("parallel",)),
        cost_estimate=cost,
    )(v_planes, lam)

    # Single stacked transpose back to (2, BH, N, N), then build the complex.
    out = out[..., :BH]                                            # (2, N, N, BH)
    out = jnp.transpose(out, (0, 3, 1, 2)).reshape(2, B, H, N, N)
    return lax.complex(out[0], out[1])


def qnorm_reference(x):
    """Plain-JAX mirror of the PyTorch forward, for validation."""
    v1, v2 = jnp.linalg.eigh(x)
    v2_H = jnp.conjugate(jnp.swapaxes(v2, -1, -2))
    dia = v1[..., None, :] * jnp.eye(x.shape[-1], dtype=x.dtype)
    result = v2 @ dia @ v2_H
    n = x.shape[-1]
    eye = jnp.eye(n, dtype=jnp.float32)
    imag = jnp.imag(result) * (1.0 - eye)
    return lax.complex(jnp.real(result), imag)


def _make_hermitian(key, B, H, N):
    kr, ki = jax.random.split(key)
    a_r = jax.random.normal(kr, (B, H, N, N), dtype=jnp.float32)
    a_i = jax.random.normal(ki, (B, H, N, N), dtype=jnp.float32)
    a = lax.complex(a_r, a_i)
    return (0.5 * (a + jnp.conjugate(jnp.swapaxes(a, -1, -2)))).astype(jnp.complex64)


if __name__ == "__main__":
    # Primary check: module-sized input (embed_dim -> N = 16).
    B, H, N = 2, 4, 16
    x = _make_hermitian(jax.random.PRNGKey(0), B, H, N)
    out = jax.block_until_ready(qnorm_forward(x))
    ref = jax.block_until_ready(qnorm_reference(x))
    assert out.shape == (B, H, N, N) and out.dtype == jnp.complex64
    assert jnp.allclose(jnp.real(out), jnp.real(ref), atol=1e-3, rtol=1e-3)
    assert jnp.allclose(jnp.imag(out), jnp.imag(ref), atol=1e-3, rtol=1e-3)

    # Secondary check: exercise the lane-dense multi-step-grid path (TB=128, 2 steps).
    B2, H2 = 16, 16
    x2 = _make_hermitian(jax.random.PRNGKey(1), B2, H2, N)
    out2 = jax.block_until_ready(qnorm_forward(x2))
    ref2 = jax.block_until_ready(qnorm_reference(x2))
    assert jnp.allclose(jnp.real(out2), jnp.real(ref2), atol=1e-3, rtol=1e-3)
    assert jnp.allclose(jnp.imag(out2), jnp.imag(ref2), atol=1e-3, rtol=1e-3)

    print("KERNEL_OK")
</pallas_src>

<mosaic_0001>
module attributes {stable_mosaic.version = 11 : i64} {
  func.func @qnorm_kernel(%arg0: i32, %arg1: memref<2x16x16x8xf32, #tpu.memory_space<vmem>>, %arg2: memref<16x8xf32, #tpu.memory_space<vmem>>, %arg3: memref<2x16x16x8xf32, #tpu.memory_space<vmem>>) attributes {dimension_semantics = [#tpu.dimension_semantics<parallel>], iteration_bounds = array<i64: 1>, scalar_prefetch = 0 : i64, scratch_operands = 0 : i64, tpu.core_type = #tpu.core_type<tc>, window_params = [{transform_indices = @transform_0, window_bounds = array<i64: 2, 16, 16, 8>}, {transform_indices = @transform_1, window_bounds = array<i64: 16, 8>}, {transform_indices = @transform_2, window_bounds = array<i64: 2, 16, 16, 8>}]} {
    %c0_i32 = arith.constant 0 : i32
    %c16_i32 = arith.constant 16 : i32
    %0 = arith.addi %c0_i32, %c16_i32 : i32
    %c1_i32 = arith.constant 1 : i32
    scf.for %arg4 = %c0_i32 to %0 step %c1_i32  : i32 {
      %c0 = arith.constant 0 : index
      %c0_1 = arith.constant 0 : index
      %1 = vector.load %arg2[%c0, %c0_1] : memref<16x8xf32, #tpu.memory_space<vmem>>, vector<16x8xf32>
      %c0_2 = arith.constant 0 : index
      %2 = arith.index_cast %arg4 : i32 to index
      %c0_3 = arith.constant 0 : index
      %c0_4 = arith.constant 0 : index
      %3 = vector.load %arg1[%c0_2, %2, %c0_3, %c0_4] : memref<2x16x16x8xf32, #tpu.memory_space<vmem>>, vector<1x1x16x8xf32>
      %4 = vector.shape_cast %3 : vector<1x1x16x8xf32> to vector<1x16x8xf32>
      %5 = vector.shape_cast %4 : vector<1x16x8xf32> to vector<16x8xf32>
      %6 = arith.mulf %1, %5 : vector<16x8xf32>
      %c1 = arith.constant 1 : index
      %7 = arith.index_cast %arg4 : i32 to index
      %c0_5 = arith.constant 0 : index
      %c0_6 = arith.constant 0 : index
      %8 = vector.load %arg1[%c1, %7, %c0_5, %c0_6] : memref<2x16x16x8xf32, #tpu.memory_space<vmem>>, vector<1x1x16x8xf32>
      %9 = vector.shape_cast %8 : vector<1x1x16x8xf32> to vector<1x16x8xf32>
      %10 = vector.shape_cast %9 : vector<1x16x8xf32> to vector<16x8xf32>
      %11 = arith.mulf %1, %10 : vector<16x8xf32>
      %c0_i32_7 = arith.constant 0 : i32
      %c16_i32_8 = arith.constant 16 : i32
      %12 = arith.subi %c16_i32_8, %arg4 : i32
      %13 = arith.addi %arg4, %12 : i32
      %c1_i32_9 = arith.constant 1 : i32
      scf.for %arg5 = %arg4 to %13 step %c1_i32_9  : i32 {
        %c0_12 = arith.constant 0 : index
        %20 = arith.index_cast %arg5 : i32 to index
        %c0_13 = arith.constant 0 : index
        %c0_14 = arith.constant 0 : index
        %21 = vector.load %arg1[%c0_12, %20, %c0_13, %c0_14] : memref<2x16x16x8xf32, #tpu.memory_space<vmem>>, vector<1x1x16x8xf32>
        %22 = vector.shape_cast %21 : vector<1x1x16x8xf32> to vector<1x16x8xf32>
        %23 = vector.shape_cast %22 : vector<1x16x8xf32> to vector<16x8xf32>
        %c1_15 = arith.constant 1 : index
        %24 = arith.index_cast %arg5 : i32 to index
        %c0_16 = arith.constant 0 : index
        %c0_17 = arith.constant 0 : index
        %25 = vector.load %arg1[%c1_15, %24, %c0_16, %c0_17] : memref<2x16x16x8xf32, #tpu.memory_space<vmem>>, vector<1x1x16x8xf32>
        %26 = vector.shape_cast %25 : vector<1x1x16x8xf32> to vector<1x16x8xf32>
        %27 = vector.shape_cast %26 : vector<1x16x8xf32> to vector<16x8xf32>
        %28 = arith.mulf %6, %23 : vector<16x8xf32>
        %29 = arith.mulf %11, %27 : vector<16x8xf32>
        %30 = arith.addf %28, %29 : vector<16x8xf32>
        %cst_18 = arith.constant dense<0.000000e+00> : vector<8xf32>
        %31 = vector.multi_reduction <add>, %30, %cst_18 [0] : vector<16x8xf32> to vector<8xf32>
        %32 = vector.shape_cast %31 : vector<8xf32> to vector<1x1x8xf32>
        %33 = arith.mulf %11, %23 : vector<16x8xf32>
        %34 = arith.mulf %6, %27 : vector<16x8xf32>
        %35 = arith.subf %33, %34 : vector<16x8xf32>
        %cst_19 = arith.constant dense<0.000000e+00> : vector<8xf32>
        %36 = vector.multi_reduction <add>, %35, %cst_19 [0] : vector<16x8xf32> to vector<8xf32>
        %37 = vector.shape_cast %36 : vector<8xf32> to vector<1x1x8xf32>
        %c0_20 = arith.constant 0 : index
        %38 = arith.index_cast %arg4 : i32 to index
        %39 = arith.index_cast %arg5 : i32 to index
        %c0_21 = arith.constant 0 : index
        %40 = vector.load %arg3[%c0_20, %38, %39, %c0_21] : memref<2x16x16x8xf32, #tpu.memory_space<vmem>>, vector<1x1x1x8xf32>
        %41 = vector.shape_cast %40 : vector<1x1x1x8xf32> to vector<1x1x8xf32>
        %42 = vector.shape_cast %32 : vector<1x1x8xf32> to vector<1x1x1x8xf32>
        tpu.vector_store %arg3[%c0_20, %38, %39, %c0_21], %42 {strides = array<i32>} : memref<2x16x16x8xf32, #tpu.memory_space<vmem>>, vector<1x1x1x8xf32>,
        %c1_22 = arith.constant 1 : index
        %43 = arith.index_cast %arg4 : i32 to index
        %44 = arith.index_cast %arg5 : i32 to index
        %c0_23 = arith.constant 0 : index
        %45 = vector.load %arg3[%c1_22, %43, %44, %c0_23] : memref<2x16x16x8xf32, #tpu.memory_space<vmem>>, vector<1x1x1x8xf32>
        %46 = vector.shape_cast %45 : vector<1x1x1x8xf32> to vector<1x1x8xf32>
        %47 = vector.shape_cast %37 : vector<1x1x8xf32> to vector<1x1x1x8xf32>
        tpu.vector_store %arg3[%c1_22, %43, %44, %c0_23], %47 {strides = array<i32>} : memref<2x16x16x8xf32, #tpu.memory_space<vmem>>, vector<1x1x1x8xf32>,
        %c0_24 = arith.constant 0 : index
        %48 = arith.index_cast %arg5 : i32 to index
        %49 = arith.index_cast %arg4 : i32 to index
        %c0_25 = arith.constant 0 : index
        %50 = vector.load %arg3[%c0_24, %48, %49, %c0_25] : memref<2x16x16x8xf32, #tpu.memory_space<vmem>>, vector<1x1x1x8xf32>
        %51 = vector.shape_cast %50 : vector<1x1x1x8xf32> to vector<1x1x8xf32>
        %52 = vector.shape_cast %32 : vector<1x1x8xf32> to vector<1x1x1x8xf32>
        tpu.vector_store %arg3[%c0_24, %48, %49, %c0_25], %52 {strides = array<i32>} : memref<2x16x16x8xf32, #tpu.memory_space<vmem>>, vector<1x1x1x8xf32>,
        %cst_26 = arith.constant 0.000000e+00 : f32
        %53 = vector.broadcast %cst_26 : f32 to vector<1x1x8xf32>
        %54 = arith.subf %53, %37 : vector<1x1x8xf32>
        %c1_27 = arith.constant 1 : index
        %55 = arith.index_cast %arg5 : i32 to index
        %56 = arith.index_cast %arg4 : i32 to index
        %c0_28 = arith.constant 0 : index
        %57 = vector.load %arg3[%c1_27, %55, %56, %c0_28] : memref<2x16x16x8xf32, #tpu.memory_space<vmem>>, vector<1x1x1x8xf32>
        %58 = vector.shape_cast %57 : vector<1x1x1x8xf32> to vector<1x1x8xf32>
        %59 = vector.shape_cast %54 : vector<1x1x8xf32> to vector<1x1x1x8xf32>
        tpu.vector_store %arg3[%c1_27, %55, %56, %c0_28], %59 {strides = array<i32>} : memref<2x16x16x8xf32, #tpu.memory_space<vmem>>, vector<1x1x1x8xf32>,
      }
      %cst = arith.constant 0.000000e+00 : f32
      %14 = vector.broadcast %cst : f32 to vector<1x1x8xf32>
      %c1_10 = arith.constant 1 : index
      %15 = arith.index_cast %arg4 : i32 to index
      %16 = arith.index_cast %arg4 : i32 to index
      %c0_11 = arith.constant 0 : index
      %17 = vector.load %arg3[%c1_10, %15, %16, %c0_11] : memref<2x16x16x8xf32, #tpu.memory_space<vmem>>, vector<1x1x1x8xf32>
      %18 = vector.shape_cast %17 : vector<1x1x1x8xf32> to vector<1x1x8xf32>
      %19 = vector.shape_cast %14 : vector<1x1x8xf32> to vector<1x1x1x8xf32>
      tpu.vector_store %arg3[%c1_10, %15, %16, %c0_11], %19 {strides = array<i32>} : memref<2x16x16x8xf32, #tpu.memory_space<vmem>>, vector<1x1x1x8xf32>,
    }
    %c16_i32_0 = arith.constant 16 : i32
    return
  }
  func.func @transform_0(%arg0: i32) -> (i32, i32, i32, i32) {
    %c0_i32 = arith.constant 0 : i32
    %c0_i32_0 = arith.constant 0 : i32
    %c0_i32_1 = arith.constant 0 : i32
    %c0_i32_2 = arith.constant 0 : i32
    return %c0_i32, %c0_i32_0, %c0_i32_1, %arg0 : i32, i32, i32, i32
  }
  func.func @transform_1(%arg0: i32) -> (i32, i32) {
    %c0_i32 = arith.constant 0 : i32
    %c0_i32_0 = arith.constant 0 : i32
    return %c0_i32, %arg0 : i32, i32
  }
  func.func @transform_2(%arg0: i32) -> (i32, i32, i32, i32) {
    %c0_i32 = arith.constant 0 : i32
    %c0_i32_0 = arith.constant 0 : i32
    %c0_i32_1 = arith.constant 0 : i32
    %c0_i32_2 = arith.constant 0 : i32
    return %c0_i32, %c0_i32_0, %c0_i32_1, %arg0 : i32, i32, i32, i32
  }
}

</mosaic_0001>

<bundles_post_ra>
// kernel: custom-call.1
= control target key start
LH: loop header
LB: loop body
LE: loop exit
PB: predicated region body
PF: predicated region fallthrough
CT: control target
= control target key end

     0   :  { %s217_s0 = inlined_call_operand.vmem [shape: c64[2,4,16,16], index: 0, kind: input, shape index: {}]   ;;  %s218_s1 = inlined_call_operand.vmem [shape: f32[2,4,16,16], index: 1, kind: output, shape index: {}]  }
   0x1   :  { %v80_v0 = vld [vmem:[%s217_s0 + $0x80] sm:$0xff]  ;;  %v81_v1 = vld [vmem:[%s217_s0 + $0x88] sm:$0xff]  ;;  %v83_v2 = vld [vmem:[%s217_s0 + $0x90] sm:$0xff] }
   0x2   :  { %4 = vst [vmem:[%s218_s1] sm:$0xff] %v80_v0  ;;  %82 = vst [vmem:[%s218_s1 + $0x8] sm:$0xff] %v81_v1  ;;  %v85_v3 = vld [vmem:[%s217_s0 + $0x98] sm:$0xff]  ;;  %v87_v4 = vld [vmem:[%s217_s0 + $0xa0] sm:$0xff] }
   0x3   :  { %84 = vst [vmem:[%s218_s1 + $0x10] sm:$0xff] %v83_v2  ;;  %v89_v5 = vld [vmem:[%s217_s0 + $0xa8] sm:$0xff]  ;;  %86 = vst [vmem:[%s218_s1 + $0x18] sm:$0xff] %v85_v3  ;;  %v91_v6 = vld [vmem:[%s217_s0 + $0xb0] sm:$0xff] }
   0x4   :  { %88 = vst [vmem:[%s218_s1 + $0x20] sm:$0xff] %v87_v4  ;;  %90 = vst [vmem:[%s218_s1 + $0x28] sm:$0xff] %v89_v5  ;;  %v93_v7 = vld [vmem:[%s217_s0 + $0xb8] sm:$0xff]  ;;  %v95_v8 = vld [vmem:[%s217_s0 + $0xc0] sm:$0xff] }
   0x5   :  { %92 = vst [vmem:[%s218_s1 + $0x30] sm:$0xff] %v91_v6  ;;  %94 = vst [vmem:[%s218_s1 + $0x38] sm:$0xff] %v93_v7  ;;  %v97_v9 = vld [vmem:[%s217_s0 + $0xc8] sm:$0xff]  ;;  %v99_v10 = vld [vmem:[%s217_s0 + $0xd0] sm:$0xff] }
   0x6   :  { %96 = vst [vmem:[%s218_s1 + $0x40] sm:$0xff] %v95_v8  ;;  %v101_v11 = vld [vmem:[%s217_s0 + $0xd8] sm:$0xff]  ;;  %98 = vst [vmem:[%s218_s1 + $0x48] sm:$0xff] %v97_v9  ;;  %v103_v12 = vld [vmem:[%s217_s0 + $0xe0] sm:$0xff] }
   0x7   :  { %100 = vst [vmem:[%s218_s1 + $0x50] sm:$0xff] %v99_v10  ;;  %102 = vst [vmem:[%s218_s1 + $0x58] sm:$0xff] %v101_v11  ;;  %v105_v13 = vld [vmem:[%s217_s0 + $0xe8] sm:$0xff]  ;;  %v107_v14 = vld [vmem:[%s217_s0 + $0xf0] sm:$0xff] }
   0x8   :  { %104 = vst [vmem:[%s218_s1 + $0x60] sm:$0xff] %v103_v12  ;;  %106 = vst [vmem:[%s218_s1 + $0x68] sm:$0xff] %v105_v13  ;;  %v109_v15 = vld [vmem:[%s217_s0 + $0xf8] sm:$0xff] }
   0x9   :  { %108 = vst [vmem:[%s218_s1 + $0x70] sm:$0xff] %v107_v14  ;;  %110 = vst [vmem:[%s218_s1 + $0x78] sm:$0xff] %v109_v15 }

// kernel: custom-call
= control target key start
LH: loop header
LB: loop body
LE: loop exit
PB: predicated region body
PF: predicated region fallthrough
CT: control target
= control target key end

     0   :  { %s200_s0 = inlined_call_operand.vmem [shape: c64[2,4,16,16], index: 0, kind: input, shape index: {}]   ;;  %s201_s1 = inlined_call_operand.vmem [shape: f32[2,4,16,16], index: 1, kind: output, shape index: {}]  }
   0x1   :  { %v2_v0 = vld [vmem:[%s200_s0] sm:$0xff]  ;;  %v64_v1 = vld [vmem:[%s200_s0 + $0x8] sm:$0xff]  ;;  %v66_v2 = vld [vmem:[%s200_s0 + $0x10] sm:$0xff] }
   0x2   :  { %3 = vst [vmem:[%s201_s1] sm:$0xff] %v2_v0  ;;  %65 = vst [vmem:[%s201_s1 + $0x8] sm:$0xff] %v64_v1  ;;  %v68_v3 = vld [vmem:[%s200_s0 + $0x18] sm:$0xff]  ;;  %v70_v4 = vld [vmem:[%s200_s0 + $0x20] sm:$0xff] }
   0x3   :  { %67 = vst [vmem:[%s201_s1 + $0x10] sm:$0xff] %v66_v2  ;;  %v72_v5 = vld [vmem:[%s200_s0 + $0x28] sm:$0xff]  ;;  %69 = vst [vmem:[%s201_s1 + $0x18] sm:$0xff] %v68_v3  ;;  %v74_v6 = vld [vmem:[%s200_s0 + $0x30] sm:$0xff] }
   0x4   :  { %71 = vst [vmem:[%s201_s1 + $0x20] sm:$0xff] %v70_v4  ;;  %73 = vst [vmem:[%s201_s1 + $0x28] sm:$0xff] %v72_v5  ;;  %v76_v7 = vld [vmem:[%s200_s0 + $0x38] sm:$0xff]  ;;  %v78_v8 = vld [vmem:[%s200_s0 + $0x40] sm:$0xff] }
   0x5   :  { %75 = vst [vmem:[%s201_s1 + $0x30] sm:$0xff] %v74_v6  ;;  %77 = vst [vmem:[%s201_s1 + $0x38] sm:$0xff] %v76_v7  ;;  %v80_v9 = vld [vmem:[%s200_s0 + $0x48] sm:$0xff]  ;;  %v82_v10 = vld [vmem:[%s200_s0 + $0x50] sm:$0xff] }
   0x6   :  { %79 = vst [vmem:[%s201_s1 + $0x40] sm:$0xff] %v78_v8  ;;  %v84_v11 = vld [vmem:[%s200_s0 + $0x58] sm:$0xff]  ;;  %81 = vst [vmem:[%s201_s1 + $0x48] sm:$0xff] %v80_v9  ;;  %v86_v12 = vld [vmem:[%s200_s0 + $0x60] sm:$0xff] }
   0x7   :  { %83 = vst [vmem:[%s201_s1 + $0x50] sm:$0xff] %v82_v10  ;;  %85 = vst [vmem:[%s201_s1 + $0x58] sm:$0xff] %v84_v11  ;;  %v88_v13 = vld [vmem:[%s200_s0 + $0x68] sm:$0xff]  ;;  %v90_v14 = vld [vmem:[%s200_s0 + $0x70] sm:$0xff] }
   0x8   :  { %87 = vst [vmem:[%s201_s1 + $0x60] sm:$0xff] %v86_v12  ;;  %89 = vst [vmem:[%s201_s1 + $0x68] sm:$0xff] %v88_v13  ;;  %v92_v15 = vld [vmem:[%s200_s0 + $0x78] sm:$0xff] }
   0x9   :  { %91 = vst [vmem:[%s201_s1 + $0x70] sm:$0xff] %v90_v14  ;;  %93 = vst [vmem:[%s201_s1 + $0x78] sm:$0xff] %v92_v15 }

// kernel: custom-call.2
= control target key start
LH: loop header
LB: loop body
LE: loop exit
PB: predicated region body
PF: predicated region fallthrough
CT: control target
= control target key end

     0   :  { %s126_s0 = inlined_call_operand.vmem [shape: f32[2,4,16,16], index: 0, kind: input, shape index: {}]   ;;  %s127_s1 = inlined_call_operand.vmem [shape: f32[2,4,16,16], index: 1, kind: input, shape index: {}]   ;;  %s128_s2 = inlined_call_operand.hbm [shape: c64[2,4,16,16], index: 2, kind: output, shape index: {}]  }
   0x1   :  { %s87_s11 = scalar_lea.hbm %s128_s2, 2048 }
   0x2   :  { %4 = vsyncpa [#allocation0], 0  ;;  %s5_s14 = sshll.u32 %s126_s0, 4  ;;  %s6_s14 = int_to_ptr.vmem [resolvable:$true] %s5_s14 }
   0x3   :  { %s18_s15 = scalar_lea.vmem %s6_s14, 2048  ;;  %p23_p1 = scmp.lt.s32.totalorder %s6_s14, %s6_s14 }
   0x4   :  { %p19_p0 = scmp.ne.s32.totalorder %s6_s14, %s18_s15  ;;  %p24_p2 = scmp.lt.s32.totalorder %s18_s15, %s18_s15 }
   0x6   :  { %p25_p3 = por %p24_p2, %p23_p1 }
   0x8   :  { %p26_p4 = pnand %p25_p3, %p19_p0 }
   0xa   :  { %29 = shalt.err (!%p26_p4)  }
   0xb   :  { %p31_p5 = scmp.ne.s32.totalorder %s128_s2, %s87_s11  ;;  %s32_s0 = scalar_lea.hbm %s128_s2, 4096 }
   0xc   :  { %p33_p6 = scmp.lt.u32.totalorder %s32_s0, %s87_s11  ;;  %p34_p7 = scmp.lt.u32.totalorder %s87_s11, %s128_s2 }
   0xe   :  { %p35_p8 = por %p34_p7, %p33_p6 }
  0x10   :  { %p36_p9 = pnand %p35_p8, %p31_p5 }
  0x12   :  { %39 = shalt.err (!%p36_p9)  }
  0x13   :  { %8 = dma.vmem_to_hbm [thread:$0]  %s6_s14, 2048, %s128_s2, [#allocation0] }
  0x14   :  { %65 = dma.done.wait [#allocation0], 2048  }
  0x15   :  { %66 = vsyncadd [#allocation0], 4294965248 }
  0x16   :  { %10 = vsyncpa [#allocation0], 1 }
  0x17   :  { %11 = vsyncpa [#allocation1], 0  ;;  %s12_s28 = sshll.u32 %s127_s1, 4  ;;  %s13_s28 = int_to_ptr.vmem [resolvable:$true] %s12_s28 }
  0x18   :  { %s40_s29 = scalar_lea.vmem %s13_s28, 2048  ;;  %p45_p11 = scmp.lt.s32.totalorder %s13_s28, %s13_s28 }
  0x19   :  { %p41_p10 = scmp.ne.s32.totalorder %s13_s28, %s40_s29  ;;  %p46_p12 = scmp.lt.s32.totalorder %s40_s29, %s40_s29 }
  0x1b   :  { %p47_p13 = por %p46_p12, %p45_p11 }
  0x1d   :  { %p48_p0 = pnand %p47_p13, %p41_p10 }
  0x1f   :  { %51 = shalt.err (!%p48_p0)  }
  0x20   :  { %p53_p1 = scmp.ne.s32.totalorder %s87_s11, %s32_s0  ;;  %p56_p2 = scmp.lt.u32.totalorder %s32_s0, %s32_s0 }
  0x22   :  { %p57_p3 = por %p56_p2, %p34_p7 }
  0x24   :  { %p59_p4 = por %p57_p3, %p33_p6 }
  0x26   :  { %p60_p5 = pnand %p59_p4, %p53_p1 }
  0x28   :  { %63 = shalt.err (!%p60_p5)  }
  0x29   :  { %15 = dma.vmem_to_hbm [thread:$0]  %s13_s28, 2048, %s87_s11, [#allocation1] }
  0x2a   :  { %67 = dma.done.wait [#allocation1], 2048  }
  0x2b   :  { %68 = vsyncadd [#allocation1], 4294965248 }
  0x2c   :  { %17 = vsyncpa [#allocation1], 1 }

// kernel: qnorm_forward.1
= control target key start
LH: loop header
LB: loop body
LE: loop exit
PB: predicated region body
PF: predicated region fallthrough
CT: control target
= control target key end

     0   :  { %s200_s9 = smov 0   ;;  %s257_s0 = inlined_call_operand.vmem [shape: f32[2,16,16,8], index: 0, kind: input, shape index: {}]   ;;  %s258_s1 = inlined_call_operand.vmem [shape: f32[16,8], index: 1, kind: input, shape index: {}]   ;;  %s259_s2 = inlined_call_operand.vmem [shape: f32[2,16,16,8], index: 2, kind: output, shape index: {}]  }
   0x1 LB: > { %v17_v0 = vld [vmem:[%s258_s1] sm:$0xff]  ;;  %v18_v1 = vld [vmem:[%s258_s1 + $0x8] sm:$0xff]  ;;  %s212_s14 = sshll.u32 %s178_s9, 4  ;;  %p128_p0 = scmp.ge.s32.totalorder %s178_s9, 16  ;;  %s178_s9 = sphi %s200_s9, %s16_s9  }
   0x2   : > { %s20_s17 = scalar_lea.vmem %s257_s0, %s212_s14  ;;  %s260_s18 = smov (!%p128_p0), %s178_s9 }
   0x3   : > { %v21_v2 = vld [vmem:[%s20_s17] sm:$0xff]  ;;  %v22_v3 = vld [vmem:[%s20_s17 + $0x8] sm:$0xff]  ;;  %129 = sbr.rel (%p128_p0) target bundleno = 36 (0x24), region = 45 }
   0x4   : > { %v139_v4 = vld [vmem:[%s20_s17 + $0x100] sm:$0xff]  ;;  %v23_v5 = vmul.f32 %v21_v2, %v17_v0  ;;  %v24_v6 = vmul.f32 %v22_v3, %v18_v1  ;;  %v140_v7 = vld [vmem:[%s20_s17 + $0x108] sm:$0xff] }
   0x5   : > { %v29_v8 = vmul.f32 %v139_v4, %v17_v0  ;;  %v30_v9 = vmul.f32 %v140_v7, %v18_v1 }
   0xa LB: >> { %s141_s19 = sshll.u32 %s182_s18, 4  ;;  %vm51_vm0 = vcmask 64512   ;;  %s76_s23 = sadd.s32 %s182_s18, %s212_s14  ;;  %vm78_vm1 = vcmask 57344   ;;  %s182_s18 = sphi %s260_s18, %s34_s18  }
   0xb   : >> { %s38_s22 = scalar_lea.vmem %s257_s0, %s141_s19  ;;  %s83_s24 = sadd.s32 %s178_s9, %s141_s19 }
   0xc   : >> { %v39_v10 = vld [vmem:[%s38_s22] sm:$0xff]  ;;  %v40_v11 = vld [vmem:[%s38_s22 + $0x8] sm:$0xff]  ;;  %s77_s27 = scalar_lea.vmem %s259_s2, %s76_s23  ;;  %s84_s30 = scalar_lea.vmem %s259_s2, %s83_s24 }
   0xd   : >> { %v143_v12 = vld [vmem:[%s38_s22 + $0x100] sm:$0xff]  ;;  %v144_v13 = vld [vmem:[%s38_s22 + $0x108] sm:$0xff]  ;;  %v45_v14 = vmul.f32 %v39_v10, %v23_v5  ;;  %v46_v15 = vmul.f32 %v40_v11, %v24_v6  ;;  %v61_v17 = vmul.f32 %v39_v10, %v29_v8  ;;  %v62_v19 = vmul.f32 %v40_v11, %v30_v9  ;;  %s34_s18 = sadd.s32 1, %s182_s18  }
   0xe   : >> { %v47_v16 = vmul.f32 %v143_v12, %v29_v8  ;;  %v48_v18 = vmul.f32 %v144_v13, %v30_v9  ;;  %v63_v20 = vmul.f32 %v143_v12, %v23_v5  ;;  %v64_v21 = vmul.f32 %v144_v13, %v24_v6  ;;  %p33_p1 = scmp.ge.s32.totalorder %s34_s18, 16 }
  0x10   : >> { %v49_v22 = vadd.f32 %v47_v16, %v45_v14  ;;  %v50_v23 = vadd.f32 %v48_v18, %v46_v15  ;;  %v65_v24 = vsub.f32 %v61_v17, %v63_v20  ;;  %v66_v25 = vsub.f32 %v62_v19, %v64_v21 }
  0x12   : >> { %v52_v26 = vsel %vm51_vm0, %v49_v22, 0.0  ;;  %v53_v27 = vsel %vm51_vm0, %v50_v23, 0.0  ;;  %v67_v28 = vsel %vm51_vm0, %v65_v24, 0.0  ;;  %v68_v29 = vsel %vm51_vm0, %v66_v25, 0.0 }
  0x13   : >> { %v54_v30 = vadd.f32 %v53_v27, %v52_v26  ;;  %v69_v31 = vadd.f32 %v68_v29, %v67_v28 }
  0x15   : >> { %v55_v32 = vrot.slane %v54_v30, 4  ;;  %v70_v33 = vrot.slane %v69_v31, 4 }
  0x17   : >> { %v56_v34 = vadd.f32 %v55_v32, %v54_v30  ;;  %v71_v35 = vadd.f32 %v70_v33, %v69_v31 }
  0x19   : >> { %v57_v36 = vrot.slane %v56_v34, 2  ;;  %v72_v37 = vrot.slane %v71_v35, 2 }
  0x1b   : >> { %v58_v38 = vadd.f32 %v57_v36, %v56_v34  ;;  %v73_v39 = vadd.f32 %v72_v37, %v71_v35 }
  0x1d   : >> { %v59_v40 = vrot.slane %v58_v38, 1  ;;  %v74_v41 = vrot.slane %v73_v39, 1  ;;  %36 = sbr.rel (!%p33_p1) target bundleno = 10 (0xa), region = 51 }
  0x1f   : >> { %v60_v42 = vadd.f32 %v59_v40, %v58_v38  ;;  %v75_v43 = vadd.f32 %v74_v41, %v73_v39 }
  0x21   : >> { %79 = vst.msk [vmem:[%s77_s27] sm:$0x1] %vm78_vm1, %v60_v42  ;;  %146 = vst.msk [vmem:[%s77_s27 + $0x100] sm:$0x1] %vm78_vm1, %v75_v43  ;;  %v86_v44 = vsub.f32 0.0, %v75_v43 }
  0x22   : >> { %85 = vst.msk [vmem:[%s84_s30] sm:$0x1] %vm78_vm1, %v60_v42 }
  0x23   : >> { %148 = vst.msk [vmem:[%s84_s30 + $0x100] sm:$0x1] %vm78_vm1, %v86_v44 }
  0x24 PF: > { %s124_s3 = sadd.s32 %s178_s9, %s212_s14  ;;  %vm93_vm2 = vcmask 57344   ;;  %v184_v45 = vmov 0.0   ;;  %s16_s9 = sadd.s32 1, %s178_s9  }
  0x25   : > { %s125_s6 = scalar_lea.vmem %s259_s2, %s124_s3  ;;  %p13_p2 = scmp.ge.s32.totalorder %s16_s9, 16  }
  0x26   : > { %150 = vst.msk [vmem:[%s125_s6 + $0x100] sm:$0x1] %vm93_vm2, %v184_v45 }
  0x27   :  { %15 = sbr.rel (!%p13_p2) target bundleno = 1 (0x1), region = 62 }

</bundles_post_ra>
